<compile_context>
chip_gen: v6e
topology: v6e:2x2x1
jax: 0.10.0
libtpu: 0.0.40
codegen_flags: <defaults>
</compile_context>

<pallas_src>
import functools

import jax
import jax.numpy as jnp
from jax.experimental import pallas as pl
from jax.experimental.pallas import tpu as pltpu

EPS = 1e-8
_LANE = 128
_SUBLANE = 8
_INPUT_BLOCK_BYTES = 2 * 1024 * 1024   # ~2 MiB f32 input per block
_VMEM_LIMIT_BYTES = 32 * 1024 * 1024   # safe on v5e/v6e (128 MiB) and v7x (64 MiB)


def _round_up(x, m):
    return ((x + m - 1) // m) * m


def _round_down(x, m):
    return (x // m) * m


def _l2norm_kernel(w_ref, x_ref, o_ref, *, groups, channels):
    # x_ref/o_ref: (1, G*C, T) -- `groups` batch elements packed along sublanes
    # w_ref:       (G*C, 128)  -- per-row (channel) scale, lane-dense tile
    for g in range(groups):  # static unroll, groups <= 8
        lo = g * channels
        hi = lo + channels
        xg = x_ref[:, lo:hi, :].astype(jnp.float32)            # (1, C, T)
        ssum = jnp.sum(xg * xg, axis=1, keepdims=True)         # (1, 1, T)
        # One exact reciprocal per spatial location on the *reduced* tensor;
        # the per-element work on the (C, T) slab is a single multiply.
        inv = pl.reciprocal(jnp.sqrt(ssum) + EPS, approx=False)
        wg = w_ref[lo:hi, 0:1]                                 # (C, 1)
        o_ref[:, lo:hi, :] = ((wg * xg) * inv).astype(o_ref.dtype)


def _pick_hw_tile(hw, rows, nb):
    """Lane-dense spatial tile from a VMEM byte budget that accounts for rows=G*C."""
    hw_full = _round_up(hw, _LANE)
    tile = _round_down(_INPUT_BLOCK_BYTES // (rows * 4), _LANE)
    tile = max(_LANE, min(tile, hw_full))
    # v7x megacore: expose >= 2 parallel grid iterations when the batch axis
    # alone cannot (costs nothing on single-TC v5e/v6e).
    if nb < 2 and hw_full >= 2 * _LANE:
        tile = min(tile, _round_up(pl.cdiv(hw_full, 2), _LANE))
    return tile


def l2norm(x, weight):
    """x: (N, C, H, W) float32, weight: (C,) float32 -> (N, C, H, W)."""
    N, C, H, W = x.shape
    HW = H * W

    # Sublane packing: when C < 8, fold G = 8 // C batch elements into the
    # sublane axis so every f32 vreg row is used.
    if C < _SUBLANE and _SUBLANE % C == 0 and N % (_SUBLANE // C) == 0:
        G = _SUBLANE // C
    else:
        G = 1
    NB = N // G
    R = G * C

    hw_tile = _pick_hw_tile(HW, R, NB)
    n_hw_tiles = pl.cdiv(HW, hw_tile)

    # Contiguous merges only -> free reshape; no jnp.pad / output slice.
    x2 = x.reshape(NB, R, HW)

    w_rows = jnp.tile(weight, G) if G > 1 else weight
    w2 = jnp.broadcast_to(w_rows.reshape(R, 1), (R, _LANE)).astype(jnp.float32)

    kernel = functools.partial(_l2norm_kernel, groups=G, channels=C)

    out = pl.pallas_call(
        kernel,
        out_shape=jax.ShapeDtypeStruct((NB, R, HW), x.dtype),
        grid_spec=pltpu.PrefetchScalarGridSpec(
            num_scalar_prefetch=0,
            grid=(NB, n_hw_tiles),
            in_specs=[
                pl.BlockSpec((R, _LANE), lambda n, t: (0, 0)),          # weight
                pl.BlockSpec((1, R, hw_tile), lambda n, t: (n, 0, t)),  # x tile
            ],
            out_specs=pl.BlockSpec((1, R, hw_tile), lambda n, t: (n, 0, t)),
        ),
        compiler_params=pltpu.CompilerParams(
            dimension_semantics=("parallel", "parallel"),
            vmem_limit_bytes=_VMEM_LIMIT_BYTES,
        ),
    )(w2, x2)

    return out.reshape(N, C, H, W)


def l2norm_ref(x, weight):
    norm = jnp.sqrt(jnp.sum(x * x, axis=1, keepdims=True)) + EPS
    return weight[None, :, None, None] * (x / norm)


if __name__ == "__main__":
    # Module config: n_channels=4, scale(gamma)=20.0 (deterministic init:
    # weight is constant-filled with gamma, exactly like reset_parameters()).
    n_channels = 4
    gamma = 20.0
    weight = jnp.full((n_channels,), gamma, dtype=jnp.float32)

    key = jax.random.PRNGKey(0)
    x = jax.random.normal(key, (2, n_channels, 16, 16), dtype=jnp.float32)

    out = l2norm(x, weight)
    out = jax.block_until_ready(out)

    ref = l2norm_ref(x, weight)
    assert out.shape == x.shape
    assert jnp.allclose(out, ref, atol=1e-5, rtol=1e-5)

    print("KERNEL_OK")
</pallas_src>

<mosaic_0001>
module attributes {stable_mosaic.version = 11 : i64} {
  func.func @_l2norm_kernel(%arg0: i32, %arg1: i32, %arg2: memref<8x128xf32, #tpu.memory_space<vmem>>, %arg3: memref<1x8x128xf32, #tpu.memory_space<vmem>>, %arg4: memref<1x8x128xf32, #tpu.memory_space<vmem>>) attributes {dimension_semantics = [#tpu.dimension_semantics<parallel>, #tpu.dimension_semantics<parallel>], iteration_bounds = array<i64: 1, 2>, scalar_prefetch = 0 : i64, scratch_operands = 0 : i64, tpu.core_type = #tpu.core_type<tc>, window_params = [{pipeline_mode = #tpu.pipeline_mode<synchronous>, transform_indices = @transform_0, window_bounds = array<i64: 8, 128>}, {transform_indices = @transform_1, window_bounds = array<i64: 1, 8, 128>}, {transform_indices = @transform_2, window_bounds = array<i64: 1, 8, 128>}]} {
    %c0 = arith.constant 0 : index
    %c0_0 = arith.constant 0 : index
    %c0_1 = arith.constant 0 : index
    %0 = vector.load %arg3[%c0, %c0_0, %c0_1] : memref<1x8x128xf32, #tpu.memory_space<vmem>>, vector<1x4x128xf32>
    %1 = arith.mulf %0, %0 : vector<1x4x128xf32>
    %cst = arith.constant dense<0.000000e+00> : vector<1x128xf32>
    %2 = vector.multi_reduction <add>, %1, %cst [1] : vector<1x4x128xf32> to vector<1x128xf32>
    %3 = vector.shape_cast %2 : vector<1x128xf32> to vector<1x1x128xf32>
    %4 = math.sqrt %3 : vector<1x1x128xf32>
    %cst_2 = arith.constant 9.99999993E-9 : f32
    %5 = vector.broadcast %cst_2 : f32 to vector<1x1x128xf32>
    %6 = arith.addf %4, %5 : vector<1x1x128xf32>
    %7 = tpu.reciprocal %6 : vector<1x1x128xf32> -> vector<1x1x128xf32>
    %c0_3 = arith.constant 0 : index
    %c0_4 = arith.constant 0 : index
    %8 = vector.load %arg2[%c0_3, %c0_4] : memref<8x128xf32, #tpu.memory_space<vmem>>, vector<4x1xf32>
    %9 = vector.shape_cast %8 : vector<4x1xf32> to vector<1x4x1xf32>
    %10 = vector.broadcast %9 : vector<1x4x1xf32> to vector<1x4x128xf32>
    %11 = arith.mulf %10, %0 : vector<1x4x128xf32>
    %12 = vector.broadcast %7 : vector<1x1x128xf32> to vector<1x4x128xf32>
    %13 = arith.mulf %11, %12 : vector<1x4x128xf32>
    %c0_5 = arith.constant 0 : index
    %c0_6 = arith.constant 0 : index
    %c0_7 = arith.constant 0 : index
    %14 = vector.load %arg4[%c0_5, %c0_6, %c0_7] : memref<1x8x128xf32, #tpu.memory_space<vmem>>, vector<1x4x128xf32>
    tpu.vector_store %arg4[%c0_5, %c0_6, %c0_7], %13 {strides = array<i32>} : memref<1x8x128xf32, #tpu.memory_space<vmem>>, vector<1x4x128xf32>,
    %c0_8 = arith.constant 0 : index
    %c4 = arith.constant 4 : index
    %c0_9 = arith.constant 0 : index
    %15 = vector.load %arg3[%c0_8, %c4, %c0_9] : memref<1x8x128xf32, #tpu.memory_space<vmem>>, vector<1x4x128xf32>
    %16 = arith.mulf %15, %15 : vector<1x4x128xf32>
    %cst_10 = arith.constant dense<0.000000e+00> : vector<1x128xf32>
    %17 = vector.multi_reduction <add>, %16, %cst_10 [1] : vector<1x4x128xf32> to vector<1x128xf32>
    %18 = vector.shape_cast %17 : vector<1x128xf32> to vector<1x1x128xf32>
    %19 = math.sqrt %18 : vector<1x1x128xf32>
    %cst_11 = arith.constant 9.99999993E-9 : f32
    %20 = vector.broadcast %cst_11 : f32 to vector<1x1x128xf32>
    %21 = arith.addf %19, %20 : vector<1x1x128xf32>
    %22 = tpu.reciprocal %21 : vector<1x1x128xf32> -> vector<1x1x128xf32>
    %c4_12 = arith.constant 4 : index
    %c0_13 = arith.constant 0 : index
    %23 = vector.load %arg2[%c4_12, %c0_13] : memref<8x128xf32, #tpu.memory_space<vmem>>, vector<4x1xf32>
    %24 = vector.shape_cast %23 : vector<4x1xf32> to vector<1x4x1xf32>
    %25 = vector.broadcast %24 : vector<1x4x1xf32> to vector<1x4x128xf32>
    %26 = arith.mulf %25, %15 : vector<1x4x128xf32>
    %27 = vector.broadcast %22 : vector<1x1x128xf32> to vector<1x4x128xf32>
    %28 = arith.mulf %26, %27 : vector<1x4x128xf32>
    %c0_14 = arith.constant 0 : index
    %c4_15 = arith.constant 4 : index
    %c0_16 = arith.constant 0 : index
    %29 = vector.load %arg4[%c0_14, %c4_15, %c0_16] : memref<1x8x128xf32, #tpu.memory_space<vmem>>, vector<1x4x128xf32>
    tpu.vector_store %arg4[%c0_14, %c4_15, %c0_16], %28 {strides = array<i32>} : memref<1x8x128xf32, #tpu.memory_space<vmem>>, vector<1x4x128xf32>,
    return
  }
  func.func @transform_0(%arg0: i32, %arg1: i32) -> (i32, i32) {
    %c0_i32 = arith.constant 0 : i32
    %c0_i32_0 = arith.constant 0 : i32
    %c0_i32_1 = arith.constant 0 : i32
    return %c0_i32, %c0_i32_0 : i32, i32
  }
  func.func @transform_1(%arg0: i32, %arg1: i32) -> (i32, i32, i32) {
    %c0_i32 = arith.constant 0 : i32
    %c0_i32_0 = arith.constant 0 : i32
    return %arg0, %c0_i32, %arg1 : i32, i32, i32
  }
  func.func @transform_2(%arg0: i32, %arg1: i32) -> (i32, i32, i32) {
    %c0_i32 = arith.constant 0 : i32
    %c0_i32_0 = arith.constant 0 : i32
    return %arg0, %c0_i32, %arg1 : i32, i32, i32
  }
}

</mosaic_0001>

<bundles_post_ra>
// kernel: tpu_custom_call.1
= control target key start
LH: loop header
LB: loop body
LE: loop exit
PB: predicated region body
PF: predicated region fallthrough
CT: control target
= control target key end

     0   :  { %7 = vsyncpa [#allocation3], 0  ;;  %s777_s0 = inlined_call_operand.hbm [shape: f32[8,128], index: 0, kind: input, shape index: {}]   ;;  %s778_s1 = inlined_call_operand.hbm [shape: f32[1,8,256], index: 1, kind: input, shape index: {}]   ;;  %s779_s2 = inlined_call_operand.hbm [shape: f32[1,8,256], index: 2, kind: output, shape index: {}]  }
   0x1   :  { %8 = vsyncpa [#allocation6], 0 }
   0x2   :  { %10 = vsyncpa [#allocation6 + $0x1], 0 }
   0x3   :  { %11 = vsyncpa [#allocation4], 0 }
   0x4   :  { %13 = vsyncpa [#allocation4 + $0x1], 0  ;;  %s612_s9 = smov 0   ;;  %s614_s10 = smov 0  }
   0x5   :  { %s616_s11 = smov 0   ;;  %s618_s12 = smov 0  }
   0x6   :  { %s620_s13 = smov 0   ;;  %s622_s14 = smov 0  }
   0x7 LB: > { %s355_s15 = sadd.s32 4294967295, %s591_s14   ;;  %s356_s16 = sadd.s32 4294967294, %s591_s14   ;;  %s591_s14 = sphi %s622_s14, %s19_s14   ;;  %s587_s13 = sphi %s620_s13, %s796_s13   ;;  %s583_s12 = sphi %s618_s12, %s795_s12   ;;  %s579_s11 = sphi %s616_s11, %s794_s11   ;;  %s575_s10 = sphi %s614_s10, %s793_s10   ;;  %s571_s9 = sphi %s612_s9, %s792_s9  }
   0x8   : > { %p74_p0 = scmp.ne.s32.totalorder %s575_s10, %s571_s9  ;;  %p646_p1 = scmp.eq.s32.totalorder %s355_s15, 0 }
   0x9   : > { %p650_p2 = scmp.eq.s32.totalorder %s355_s15, 1  ;;  %p106_p3 = scmp.eq.s32.totalorder %s356_s16, 1 }
   0xa   : > { %p656_p4 = por %p646_p1, %p74_p0  ;;  %p357_p5 = scmp.ge.s32.totalorder %s591_s14, 1 }
   0xb   : > { %p661_p6 = por %p106_p3, %p74_p0  ;;  %p113_p7 = scmp.lt.s32.totalorder %s591_s14, 3 }
   0xc   : > { %s783_s19 = scalar_select %p656_p4, 1, 0 }
   0xd   : > { %s784_s20 = scalar_select %p661_p6, 1, 0 }
   0xe   : > { %p666_p8 = pnand %p357_p5, %p113_p7  ;;  %s593_s22 = smov [#allocation2]  }
   0xf   : > { %s126_s23 = sshll.u32 %s593_s22, 4  ;;  %s28_s25 = sadd.s32 1, %s587_s13  ;;  %s127_s23 = int_to_ptr.vmem [resolvable:$true] %s126_s23 }
  0x10   : > { %p378_p10 = pneg %p666_p8  ;;  %s61_s26 = sadd.s32 1, %s579_s11 }
  0x11   : > { %p29_p12 = scmp.ge.s32.totalorder %s28_s25, 2  ;;  %s464_s27 = scalar_lea.vmem %s127_s23, 128 }
  0x12   : > { %p675_p11 = pnand %p378_p10, %p646_p1  ;;  %p465_p0 = scmp.ne.s32.totalorder %s127_s23, %s464_s27 }
  0x13   : > { %p472_p7 = scmp.lt.s32.totalorder %s127_s23, %s127_s23  ;;  %p473_p6 = scmp.lt.s32.totalorder %s464_s27, %s464_s27 }
  0x14   : > { %p455_p13 = pneg %p675_p11 }
  0x15   : > { %p474_p9 = por %p473_p6, %p472_p7 }
  0x16   : > { %p467_p3 = pnand %p465_p0, %p455_p13 }
  0x18   : > { %p468_p5 = pneg %p467_p3 }
  0x1a   : > { %p475_p4 = pnand %p474_p9, %p468_p5 }
  0x1c   : > { %478 = shalt.err (!%p475_p4)
}
  0x1d   : > { %381 = dma.hbm_to_vmem [thread:$0]  (!%p675_p11), %s777_s0, 128, %s127_s23, [#allocation3]  }
  0x1e   : > { %s798_s25 = smov (%p29_p12, %s28_s25), 0  ;;  %p68_p6 = scmp.ne.s32.totalorder %s579_s11, %s575_s10 }
  0x1f   : > { %p69_p4 = scmp.eq.s32.totalorder %s591_s14, 0  ;;  %s57_s30 = ssub.s32 %s587_s13, %s798_s25 }
  0x20   : > { %p391_p9 = scmp.lt.s32.totalorder %s591_s14, 2  ;;  %p59_p10 = scmp.eq.s32.totalorder %s57_s30, 0 }
  0x21   : > { %p70_p13 = por %p69_p4, %p68_p6  ;;  %p698_p0 = por %p650_p2, %p68_p6 }
  0x22   : > { %s137_s4 = sand.u32 1, %s579_s11   ;;  %s361_s7 = sshll.u32 %s587_s13, 7 }
  0x23   : > { %s704_s5 = scalar_select %p59_p10, %s579_s11, %s61_s26  }
  0x24   : > { %s360_s6 = sshll.u32 %s137_s4, 3  ;;  %s148_s16 = scalar_lea.hbm %s778_s1, %s361_s7 }
  0x25   : > { %s141_s22 = scalar_lea.vmem [#allocation5], %s360_s6  ;;  %p710_p11 = pnand %p391_p9, %p70_p13 }
  0x26   : > { %s150_s23 = sshll.u32 %s141_s22, 4  ;;  %s138_s18 = scalar_lea.sflag [#allocation6], %s137_s4  ;;  %s151_s23 = int_to_ptr.vmem [resolvable:$true] %s150_s23 }
  0x27   : > { %p481_p2 = pneg %p710_p11  ;;  %s492_s27 = scalar_lea.vmem %s151_s23, 128 }
  0x28   : > { %p493_p12 = scmp.ne.s32.totalorder %s151_s23, %s492_s27  ;;  %s594_s26 = smov [#allocation5]  }
  0x29   : > { %s497_s28 = sshll.u32 %s594_s26, 4  ;;  %s498_s28 = int_to_ptr.vmem [resolvable:$false] %s497_s28 }
  0x2a   : > { %p495_p3 = pnand %p493_p12, %p481_p2  ;;  %s499_s29 = scalar_lea.vmem %s498_s28, 256 }
  0x2b   : > { %p500_p7 = scmp.lt.s32.totalorder %s151_s23, %s498_s28  ;;  %p501_p6 = scmp.lt.s32.totalorder %s499_s29, %s492_s27 }
  0x2c   : > { %p496_p5 = pneg %p495_p3 }
  0x2d   : > { %p502_p4 = por %p501_p6, %p500_p7 }
  0x2f   : > { %p503_p10 = pnand %p502_p4, %p496_p5 }
  0x31   : > { %506 = shalt.err (!%p503_p10)
}
  0x32   : > { %385 = dma.hbm_to_vmem [thread:$0]  (!%p710_p11), %s148_s16, 128, %s151_s23, %s138_s18  }
  0x33   : > { %159 = sbr.rel (%p666_p8) target bundleno = 208 (0xd0), region = 28 }
  0x38   : > { %558 = dma.done.wait (%p646_p1), [#allocation3], 128  }
  0x39   : > { %560 = vsyncadd (%p646_p1), [#allocation3], 4294967168  ;;  %s725_s30 = sand.u32 1, %s575_s10   ;;  %p789_p9 = scmp.ne.s32.totalorder %s783_s19, 0 }
  0x3a   : > { %s364_s4 = sshll.u32 %s725_s30, 3  ;;  %s166_s6 = scalar_lea.sflag [#allocation6], %s725_s30 }
  0x3b   : > { %s169_s7 = scalar_lea.vmem [#allocation5], %s364_s4 }
  0x3c   : > { %562 = dma.done.wait (%p789_p9), %s166_s6, 128  }
  0x3d   : > { %564 = vsyncadd (%p789_p9), %s166_s6, 4294967168  ;;  %v595_v0 = vmov 0   ;;  %v209_v1 = vld [vmem:[#allocation2] sm:$0xf]  ;;  %v236_v2 = vld [vmem:[#allocation2 + $0x4] sm:$0xf] }
  0x3e   : > { %444 = vset.pattern.permute.xlu0 %v595_v0  ;;  %v190_v3 = vld [vmem:[%s169_s7] sm:$0xf]  ;;  %vm192_vm0 = vcmask 1043456   ;;  %v218_v5 = vld [vmem:[%s169_s7 + $0x4] sm:$0xf]  ;;  %s367_s17 = sshll.u32 %s583_s12, 7 }
  0x3f   : > { %212 = vperm.xlu0 %444, %v209_v1   ;;  %v191_v4 = vmul.f32 %v190_v3, %v190_v3  ;;  %v219_v7 = vmul.f32 %v218_v5, %v218_v5  ;;  %s189_s19 = scalar_lea.vmem [#allocation7], %s364_s4  ;;  %s259_s16 = scalar_lea.hbm %s779_s2, %s367_s17 }
  0x40   : > { %s261_s21 = sshll.u32 %s189_s19, 4  ;;  %s246_s22 = scalar_lea.sflag [#allocation4], %s725_s30  ;;  %s262_s21 = int_to_ptr.vmem [resolvable:$true] %s261_s21 }
  0x41   : > { %v193_v6 = vsel %vm192_vm0, %v191_v4, 0.0  ;;  %v220_v9 = vsel %vm192_vm0, %v219_v7, 0.0  ;;  %s507_s23 = scalar_lea.vmem %s262_s21, 128  ;;  %s596_s24 = smov [#allocation7]  }
  0x42   : > { %v194_v8 = vrot.slane %v193_v6, 4  ;;  %v221_v11 = vrot.slane %v220_v9, 4  ;;  %p508_p1 = scmp.ne.s32.totalorder %s262_s21, %s507_s23  ;;  %s511_s12 = sshll.u32 %s596_s24, 4  ;;  %s512_s12 = int_to_ptr.vmem [resolvable:$false] %s511_s12 }
  0x43   : > { %239 = vperm.xlu0 %444, %v236_v2   ;;  %s513_s18 = scalar_lea.vmem %s512_s12, 256  ;;  %p514_p11 = scmp.lt.s32.totalorder %s262_s21, %s512_s12 }
  0x44   : > { %v195_v10 = vadd.f32 %v194_v8, %v193_v6  ;;  %v222_v13 = vadd.f32 %v221_v11, %v220_v9  ;;  %p509_p8 = pnand %p508_p1, %p698_p0  ;;  %p515_p2 = scmp.lt.s32.totalorder %s513_s18, %s507_s23 }
  0x46   : > { %v196_v12 = vrot.slane %v195_v10, 2  ;;  %v223_v15 = vrot.slane %v222_v13, 2  ;;  %p510_p13 = pneg %p509_p8  ;;  %p516_p12 = por %p515_p2, %p514_p11 }
  0x48   : > { %v197_v14 = vadd.f32 %v196_v12, %v195_v10  ;;  %v224_v17 = vadd.f32 %v223_v15, %v222_v13  ;;  %p517_p3 = pnand %p516_p12, %p510_p13 }
  0x4a   : > { %v198_v16 = vrot.slane %v197_v14, 1  ;;  %v225_v19 = vrot.slane %v224_v17, 1 }
  0x4c   : > { %v199_v18 = vadd.f32 %v198_v16, %v197_v14  ;;  %v226_v20 = vadd.f32 %v225_v19, %v224_v17 }
  0x4e   : > { %445 = vrsqrt.f32 %v199_v18  ;;  %vm202_vm1 = vcmp.eq.f32.partialorder %v199_v18, inf  ;;  %v205_v24 = vand.u32 2147483648, %v199_v18  ;;  %vm204_vm2 = vcmp.eq.f32.partialorder %v199_v18, 0.0 }
  0x4f   : > { %447 = vrsqrt.f32 %v226_v20  ;;  %vm229_vm3 = vcmp.eq.f32.partialorder %v226_v20, inf  ;;  %v232_v28 = vand.u32 2147483648, %v226_v20  ;;  %vm231_vm4 = vcmp.eq.f32.partialorder %v226_v20, 0.0 }
  0x5b   : > { %v446_v21 = vpop.eup %445 }
  0x5c   : > { %v201_v22 = vmul.f32 %v446_v21, %v199_v18  ;;  %v448_v23 = vpop.eup %447 }
  0x5d   : > { %v228_v26 = vmul.f32 %v448_v23, %v226_v20 }
  0x5e   : > { %v203_v25 = vsel %vm202_vm1, %v199_v18, %v201_v22 }
  0x5f   : > { %v206_v27 = vsel %vm204_vm2, %v205_v24, %v203_v25  ;;  %v230_v29 = vsel %vm229_vm3, %v226_v20, %v228_v26 }
  0x60   : > { %v207_v30 = vadd.f32 1e-08, %v206_v27  ;;  %v233_v31 = vsel %vm231_vm4, %v232_v28, %v230_v29 }
  0x61   : > { %v234_v32 = vadd.f32 1e-08, %v233_v31 }
  0x62   : > { %449 = vrcp.f32 %v207_v30 }
  0x63   : > { %451 = vrcp.f32 %v234_v32 }
  0x6f   : > { %v450_v33 = vpop.eup %449 }
  0x70   : > { %v452_v37 = vpop.eup %451 }
  0xba   : > { %v213_v34 = vpop.permute.xlu0 %212 }
  0xbb   : > { %v215_v35 = vmul.f32 %v213_v34, %v190_v3 }
  0xbd   : > { %v216_v36 = vmul.f32 %v450_v33, %v215_v35 }
  0xbe   : > { %v240_v38 = vpop.permute.xlu0 %239 }
  0xbf   : > { %217 = vst [vmem:[%s189_s19] sm:$0xf] %v216_v36  ;;  %v242_v39 = vmul.f32 %v240_v38, %v218_v5 }
  0xc1   : > { %v243_v40 = vmul.f32 %v452_v37, %v242_v39 }
  0xc3   : > { %244 = vst [vmem:[%s189_s19 + $0x4] sm:$0xf] %v243_v40 }
  0xc4   : > { %520 = shalt.err (!%p517_p3)
}
  0xc5   : > { %s521_s27 = scalar_lea.hbm %s259_s16, 128  ;;  %s525_s29 = scalar_lea.hbm %s779_s2, 256 }
  0xc6   : > { %p522_p5 = scmp.ne.s32.totalorder %s259_s16, %s521_s27  ;;  %p526_p4 = scmp.lt.s32.totalorder %s259_s16, %s779_s2 }
  0xc7   : > { %p527_p10 = scmp.lt.s32.totalorder %s525_s29, %s521_s27 }
  0xc8   : > { %p523_p7 = pnand %p522_p5, %p698_p0 }
  0xc9   : > { %p528_p9 = por %p527_p10, %p526_p4 }
  0xca   : > { %p524_p6 = pneg %p523_p7 }
  0xcc   : > { %p529_p1 = pnand %p528_p9, %p524_p6 }
  0xce   : > { %532 = shalt.err (!%p529_p1)
}
  0xcf   : > { %376 = dma.vmem_to_hbm [thread:$0]  (%p698_p0), %s262_s21, 128, %s259_s16, %s246_s22  }
  0xd0 PF: > { %s273_s6 = sand.u32 1, %s571_s9   ;;  %p790_p8 = scmp.ne.s32.totalorder %s784_s20, 0 }
  0xd1   : > { %p791_p13 = scmp.ge.s32.totalorder %s591_s14, 2  ;;  %s274_s7 = scalar_lea.sflag [#allocation4], %s273_s6 }
  0xd3   : > { %p387_p11 = pnand %p791_p13, %p790_p8 }
  0xd5   : > { %p388_p2 = pneg %p387_p11 }
  0xd7   : > { %566 = dma.done.wait (%p388_p2), %s274_s7, 128  }
  0xd8   : > { %568 = vsyncadd (%p388_p2), %s274_s7, 4294967168  ;;  %s19_s14 = sadd.s32 1, %s591_s14   ;;  %s792_s9 = smov %s575_s10 }
  0xd9   : > { %p16_p12 = scmp.ge.s32.totalorder %s19_s14, 4   ;;  %s793_s10 = smov %s579_s11 }
  0xda   : > { %s794_s11 = smov %s704_s5  ;;  %s795_s12 = smov %s587_s13 }
  0xdb   : > { %s796_s13 = smov %s798_s25  ;;  %18 = sbr.rel (!%p16_p12) target bundleno = 7 (0x7), region = 78 }
  0xe0   :  { %279 = vsyncpa [#allocation3], 1 }
  0xe1   :  { %281 = vsyncpa [#allocation3 + $0x1], 1 }
  0xe2   :  { %282 = vsyncpa [#allocation6], 1 }
  0xe3   :  { %284 = vsyncpa [#allocation6 + $0x1], 1 }
  0xe4   :  { %285 = vsyncpa [#allocation4], 1 }
  0xe5   :  { %287 = vsyncpa [#allocation4 + $0x1], 1 }

</bundles_post_ra>
